<compile_context>
chip_gen: v7x
topology: tpu7x:2x2x1
jax: 0.10.0
libtpu: 0.0.40
codegen_flags: <defaults>
</compile_context>

<pallas_src>
import functools

import jax
import jax.numpy as jnp
from jax.experimental import pallas as pl
from jax.experimental.pallas import tpu as pltpu


def _embed_kernel(x_ref, w_ref, pos_ref, cls_ref, o_ref):
    # x_ref  : (1, N, K)   patch matrix of one image (streamed, bf16 by default)
    # w_ref  : (D, K)      conv weight, VMEM-resident across the batch grid
    # pos_ref: (N, D)      position embeddings for patch tokens, conv bias pre-folded (f32)
    # cls_ref: (1, D)      cls_token + pos[0]  (f32)
    # o_ref  : (1, N+1, D) final embedding rows for this image
    y = jax.lax.dot_general(                       # MXU: (N, K) x (D, K)^T -> (N, D)
        x_ref[0], w_ref[...],
        dimension_numbers=(((1,), (1,)), ((), ())),
        preferred_element_type=jnp.float32)
    # Row 0: CLS token (aligned store).
    o_ref[0, 0:1, :] = cls_ref[...].astype(o_ref.dtype)
    # Rows 1..N: projected patches + (pos + bias).  Static sublane-offset store; keeps
    # the whole (N+1, D) block written by the kernel, so no wrapper-side concat is needed.
    o_ref[0, 1:, :] = (y + pos_ref[...]).astype(o_ref.dtype)


def embeddings_forward(x_nchw, conv_w, conv_b, cls_token, pos_emb, patch_size,
                       compute_dtype=jnp.bfloat16):
    """Forward pass of `Embeddings` (eval mode).

    x_nchw:    (B, C, H, W)   float32
    conv_w:    (D, C, P, P)   conv weight (PyTorch layout)
    conv_b:    (D,)           conv bias
    cls_token: (1, 1, D)
    pos_emb:   (1, N+1, D)
    returns:   (B, N+1, D)
    """
    B, C, H, W = x_nchw.shape
    P = patch_size
    D = conv_w.shape[0]
    nph, npw = H // P, W // P
    N = nph * npw
    K = C * P * P

    # --- glue: extract non-overlapping patches, flatten in (C, ph, pw) order ---------
    # TODO(synk): fuse patch extraction into the kernel DMA (read (1, C, k*P, W) NCHW
    # slabs per patch-row) to avoid materializing this rearranged copy in HBM.
    patches = x_nchw.reshape(B, C, nph, P, npw, P)
    patches = patches.transpose(0, 2, 4, 1, 3, 5).reshape(B, N, K)
    patches = patches.astype(compute_dtype)                 # bf16 stream (f32 MXU accum)

    # Weight stays (D, K): the kernel contracts over K (trans_b) -> no transpose copy.
    w_dk = conv_w.reshape(D, K).astype(compute_dtype)

    # Fold the conv bias into the patch position embeddings; precompute the CLS row.
    pos_patch = (pos_emb[0, 1:, :] + conv_b[None, :]).astype(jnp.float32)   # (N, D)
    cls_row = (cls_token[0, 0, :] + pos_emb[0, 0, :]).reshape(1, D).astype(jnp.float32)

    # Notes on block sizing:
    #  * One whole image per grid step: M = N (196..1024 for real ViTs) fills the MXU,
    #    and the (D, K) weight is VMEM-resident (constant index_map).
    #  * For typical ViT configs K and D are multiples of 128 (lane-dense stores); the
    #    toy demo (D=32, K=64) uses full-dim blocks, which is legal (perf-only caveat).
    #  * Per-batch VMEM: 2*(N*K*2 + (N+1)*D*4) + D*K*2 + (N+1)*D*4 bytes — a few MiB for
    #    ViT-B/L, well inside the 48 MiB scoped limit below (fits v7x's 64 MiB VMEM).
    #  * For B == 1 with very large N, add a token-tile grid axis to expose >=2 grid
    #    points for v7x's two TensorCores.
    out = pl.pallas_call(
        _embed_kernel,
        out_shape=jax.ShapeDtypeStruct((B, N + 1, D), x_nchw.dtype),
        grid_spec=pltpu.PrefetchScalarGridSpec(
            num_scalar_prefetch=0,
            grid=(B,),
            in_specs=[
                pl.BlockSpec((1, N, K), lambda b: (b, 0, 0)),   # patches, streamed
                pl.BlockSpec((D, K), lambda b: (0, 0)),          # weight, resident
                pl.BlockSpec((N, D), lambda b: (0, 0)),          # pos+bias, resident
                pl.BlockSpec((1, D), lambda b: (0, 0)),          # cls row, resident
            ],
            out_specs=pl.BlockSpec((1, N + 1, D), lambda b: (b, 0, 0)),
        ),
        compiler_params=pltpu.CompilerParams(
            dimension_semantics=("parallel",),
            vmem_limit_bytes=48 * 1024 * 1024,
        ),
    )(patches, w_dk, pos_patch, cls_row)

    # Dropout(hidden_dropout_prob) is identity in eval mode.
    return out


def _reference_forward(x_nchw, conv_w, conv_b, cls_token, pos_emb, patch_size):
    """Pure-JAX f32 reference (lax conv) for correctness checking."""
    y = jax.lax.conv_general_dilated(
        x_nchw, conv_w,
        window_strides=(patch_size, patch_size),
        padding="VALID",
        dimension_numbers=("NCHW", "OIHW", "NCHW"),
    ) + conv_b[None, :, None, None]
    B, D, gh, gw = y.shape
    y = y.reshape(B, D, gh * gw).transpose(0, 2, 1)          # (B, N, D)
    cls = jnp.broadcast_to(cls_token, (B, 1, D))
    y = jnp.concatenate([cls, y], axis=1) + pos_emb
    return y


if __name__ == "__main__":
    # Small config consistent with the module: image 16x16, 4 channels, patch 4, hidden 32.
    config = dict(image_size=16, patch_size=4, num_channels=4,
                  hidden_size=32, hidden_dropout_prob=0.0)
    B = 2
    C, HW, P, D = (config["num_channels"], config["image_size"],
                   config["patch_size"], config["hidden_size"])
    N = (HW // P) ** 2

    key = jax.random.PRNGKey(0)
    kx, kw, kb, kc, kp = jax.random.split(key, 5)
    x = jax.random.normal(kx, (B, C, HW, HW), dtype=jnp.float32)
    conv_w = jax.random.normal(kw, (D, C, P, P), dtype=jnp.float32) * 0.05
    conv_b = jax.random.normal(kb, (D,), dtype=jnp.float32) * 0.05
    cls_token = jax.random.normal(kc, (1, 1, D), dtype=jnp.float32)
    pos_emb = jax.random.normal(kp, (1, N + 1, D), dtype=jnp.float32)

    fwd = jax.jit(functools.partial(embeddings_forward, patch_size=P))
    out = jax.block_until_ready(fwd(x, conv_w, conv_b, cls_token, pos_emb))

    ref = _reference_forward(x, conv_w, conv_b, cls_token, pos_emb, P)
    assert out.shape == (B, N + 1, D)
    # Tolerance accounts for bf16 streaming of patches/weight (f32 MXU accumulation);
    # pass compute_dtype=jnp.float32 to embeddings_forward for bit-tighter agreement.
    err = float(jnp.max(jnp.abs(out - ref)))
    assert jnp.allclose(out, ref, atol=2e-2, rtol=2e-2), f"max abs err {err}"

    print("KERNEL_OK")
</pallas_src>

<mosaic_0001>
module attributes {stable_mosaic.version = 11 : i64} {
  func.func @_embed_kernel(%arg0: i32, %arg1: memref<1x16x64xbf16, #tpu.memory_space<vmem>>, %arg2: memref<32x64xbf16, #tpu.memory_space<vmem>>, %arg3: memref<16x32xf32, #tpu.memory_space<vmem>>, %arg4: memref<1x32xf32, #tpu.memory_space<vmem>>, %arg5: memref<1x17x32xf32, #tpu.memory_space<vmem>>) attributes {dimension_semantics = [#tpu.dimension_semantics<parallel>], iteration_bounds = array<i64: 2>, scalar_prefetch = 0 : i64, scratch_operands = 0 : i64, tpu.core_type = #tpu.core_type<tc>, window_params = [{transform_indices = @transform_0, window_bounds = array<i64: 1, 16, 64>}, {pipeline_mode = #tpu.pipeline_mode<synchronous>, transform_indices = @transform_1, window_bounds = array<i64: 32, 64>}, {pipeline_mode = #tpu.pipeline_mode<synchronous>, transform_indices = @transform_2, window_bounds = array<i64: 16, 32>}, {pipeline_mode = #tpu.pipeline_mode<synchronous>, transform_indices = @transform_3, window_bounds = array<i64: 1, 32>}, {transform_indices = @transform_4, window_bounds = array<i64: 1, 17, 32>}]} {
    %c0 = arith.constant 0 : index
    %c0_0 = arith.constant 0 : index
    %c0_1 = arith.constant 0 : index
    %0 = vector.load %arg1[%c0, %c0_0, %c0_1] : memref<1x16x64xbf16, #tpu.memory_space<vmem>>, vector<1x16x64xbf16>
    %1 = vector.shape_cast %0 : vector<1x16x64xbf16> to vector<16x64xbf16>
    %c0_2 = arith.constant 0 : index
    %c0_3 = arith.constant 0 : index
    %2 = vector.load %arg2[%c0_2, %c0_3] : memref<32x64xbf16, #tpu.memory_space<vmem>>, vector<32x64xbf16>
    %cst = arith.constant dense<0.000000e+00> : vector<16x32xf32>
    %3 = tpu.matmul %1, %2, %cst {dimension_numbers = #tpu.dot_dimension_numbers<[1], [1], [0], [0], [0, 0, 1, 0], [], []>} : vector<16x64xbf16>, vector<32x64xbf16>, vector<16x32xf32> -> vector<16x32xf32>
    %c0_4 = arith.constant 0 : index
    %c0_5 = arith.constant 0 : index
    %4 = vector.load %arg4[%c0_4, %c0_5] : memref<1x32xf32, #tpu.memory_space<vmem>>, vector<1x32xf32>
    %c0_6 = arith.constant 0 : index
    %c0_7 = arith.constant 0 : index
    %c0_8 = arith.constant 0 : index
    %5 = vector.load %arg5[%c0_6, %c0_7, %c0_8] : memref<1x17x32xf32, #tpu.memory_space<vmem>>, vector<1x1x32xf32>
    %6 = vector.shape_cast %5 : vector<1x1x32xf32> to vector<1x32xf32>
    %7 = vector.shape_cast %4 : vector<1x32xf32> to vector<1x1x32xf32>
    tpu.vector_store %arg5[%c0_6, %c0_7, %c0_8], %7 {strides = array<i32>} : memref<1x17x32xf32, #tpu.memory_space<vmem>>, vector<1x1x32xf32>,
    %c0_9 = arith.constant 0 : index
    %c0_10 = arith.constant 0 : index
    %8 = vector.load %arg3[%c0_9, %c0_10] : memref<16x32xf32, #tpu.memory_space<vmem>>, vector<16x32xf32>
    %9 = arith.addf %3, %8 : vector<16x32xf32>
    %c0_11 = arith.constant 0 : index
    %c1 = arith.constant 1 : index
    %c0_12 = arith.constant 0 : index
    %10 = vector.load %arg5[%c0_11, %c1, %c0_12] : memref<1x17x32xf32, #tpu.memory_space<vmem>>, vector<1x16x32xf32>
    %11 = vector.shape_cast %10 : vector<1x16x32xf32> to vector<16x32xf32>
    %12 = vector.shape_cast %9 : vector<16x32xf32> to vector<1x16x32xf32>
    tpu.vector_store %arg5[%c0_11, %c1, %c0_12], %12 {strides = array<i32>} : memref<1x17x32xf32, #tpu.memory_space<vmem>>, vector<1x16x32xf32>,
    return
  }
  func.func @transform_0(%arg0: i32) -> (i32, i32, i32) {
    %c0_i32 = arith.constant 0 : i32
    %c0_i32_0 = arith.constant 0 : i32
    %c0_i32_1 = arith.constant 0 : i32
    return %arg0, %c0_i32, %c0_i32_0 : i32, i32, i32
  }
  func.func @transform_1(%arg0: i32) -> (i32, i32) {
    %c0_i32 = arith.constant 0 : i32
    %c0_i32_0 = arith.constant 0 : i32
    %c0_i32_1 = arith.constant 0 : i32
    return %c0_i32, %c0_i32_0 : i32, i32
  }
  func.func @transform_2(%arg0: i32) -> (i32, i32) {
    %c0_i32 = arith.constant 0 : i32
    %c0_i32_0 = arith.constant 0 : i32
    %c0_i32_1 = arith.constant 0 : i32
    return %c0_i32, %c0_i32_0 : i32, i32
  }
  func.func @transform_3(%arg0: i32) -> (i32, i32) {
    %c0_i32 = arith.constant 0 : i32
    %c0_i32_0 = arith.constant 0 : i32
    %c0_i32_1 = arith.constant 0 : i32
    return %c0_i32, %c0_i32_0 : i32, i32
  }
  func.func @transform_4(%arg0: i32) -> (i32, i32, i32) {
    %c0_i32 = arith.constant 0 : i32
    %c0_i32_0 = arith.constant 0 : i32
    %c0_i32_1 = arith.constant 0 : i32
    return %arg0, %c0_i32, %c0_i32_0 : i32, i32, i32
  }
}

</mosaic_0001>

<bundles_post_ra>
// kernel: embeddings_forward.1
= control target key start
LH: loop header
LB: loop body
LE: loop exit
PB: predicated region body
PF: predicated region fallthrough
CT: control target
= control target key end

     0   :  { %s409_s15 = smov 0   ;;  %s444_s0 = inlined_call_operand.vmem [shape: bf16[2,16,64], index: 0, kind: input, shape index: {}]   ;;  %s445_s1 = inlined_call_operand.vmem [shape: bf16[32,64], index: 1, kind: input, shape index: {}]   ;;  %s446_s2 = inlined_call_operand.vmem [shape: f32[16,32], index: 2, kind: input, shape index: {}]   ;;  %s447_s3 = inlined_call_operand.vmem [shape: f32[1,32], index: 3, kind: input, shape index: {}]   ;;  %s448_s4 = inlined_call_operand.vmem [shape: f32[2,17,32], index: 4, kind: output, shape index: {}]  }
   0x1 LB: > { %s334_s16 = sadd.s32 4294967295, %s380_s15   ;;  %p338_p0 = scmp.ge.s32.totalorder %s380_s15, 1  ;;  %s380_s15 = sphi %s409_s15, %s14_s15  }
   0x2   : > { %p162_p1 = scmp.lt.s32.totalorder %s380_s15, 3 }
   0x4   : > { %p163_p2 = pnand %p338_p0, %p162_p1 }
   0x5   : > { %v371_v0 = vld [vmem:[%s445_s1] sm:$0xff] (!%p163_p2)   ;;  %v382_v1 = vmov (!%p163_p2), 0.0   ;;  %vm225_vm0 = vcmask (!%p163_p2), 523264   ;;  %p188_p3 = scmp.lt.s32.totalorder (!%p163_p2), %s334_s16, 1  ;;  %vm383_vm1 = vmmov (!%p163_p2), 0   ;;  %v372_v3 = vld [vmem:[%s445_s1 + $0x8] sm:$0xff] (!%p163_p2)  }
   0x6   : > { %166 = sbr.rel (%p163_p2) target bundleno = 239 (0xef), region = 36  ;;  %352 = vmatprep.subr.bf16.mxu0 (!%p163_p2), %v382_v1  ;;  %v230_v2 = vsel (!%p163_p2), %vm225_vm0, %v371_v0, 0  ;;  %356 = vmatprep.mubr.msk.bf16.mxu0 (!%p163_p2), %vm383_vm1, %v382_v1  ;;  %v205_v4 = vld [vmem:[%s447_s3] sm:$0x1] (!%p163_p2)  ;;  %vm206_vm2 = vcmask (!%p163_p2), 253952   ;;  %v233_v5 = vsel (!%p163_p2), %vm225_vm0, %v372_v3, 0 }
   0x7   : > { %353 = vmatpush3.bf16.xpose.msra.mxu0 (!%p163_p2), %v230_v2  ;;  %v208_v7 = vld [vmem:[%s446_s2] sm:$0xff] (!%p163_p2)  ;;  %vm276_vm3 = vcmask (!%p163_p2), 261120   ;;  %v209_v9 = vld [vmem:[%s446_s2 + $0x8] sm:$0xff] (!%p163_p2) }
   0x8   : > { %354 = vmatprep.subr.bf16.mxu0 (!%p163_p2), %v382_v1 }
   0xd   : > { %s450_s16 = smov (!%p188_p3, %s334_s16), 1 }
   0xe   : > { %s348_s21 = sshll.u32 %s450_s16, 3  ;;  %s360_s22 = smul.u32 24, %s450_s16 }
   0xf   : > { %s192_s27 = scalar_lea.vmem %s444_s0, %s348_s21  ;;  %355 = vmatpush3.bf16.xpose.msra.mxu0 %v233_v5 }
  0x10   : > { %s197_s30 = scalar_lea.vmem %s448_s4, %s360_s22  ;;  %v373_v6 = vld [vmem:[%s192_s27] sm:$0xff]  }
  0x11   : > { %207 = vst.msk [vmem:[%s197_s30] sm:$0x1] %vm206_vm2, %v205_v4 }
  0x16   : > { %357 = vmatmul.mubr.msk.bf16.vlgmr.msra.gmra.mrb[0].mxu0 %vm225_vm0, %v373_v6 }
  0xe9   : > { %v269_v8 = vpop.f32.mrb[0].mxu0 }
  0xea   : > { %v270_v10 = vadd.f32 %v269_v8, %v208_v7  ;;  %v358_v11 = vpop.f32.mrb[1].mxu0 }
  0xeb   : > { %v272_v12 = vpop.f32.mrb[2].mxu0 }
  0xec   : > { %277 = vst.msk [vmem:[%s197_s30 + $0x1] sm:$0xff] %vm276_vm3, %v270_v10  ;;  %v273_v13 = vadd.f32 %v272_v12, %v209_v9  ;;  %v359_v14 = vpop.f32.mrb[3].mxu0 }
  0xee   : > { %278 = vst.msk [vmem:[%s197_s30 + $0x9] sm:$0xff] %vm276_vm3, %v273_v13 }
  0xef PF: > { %s14_s15 = sadd.s32 1, %s380_s15  }
  0xf0   : > { %p11_p4 = scmp.ge.s32.totalorder %s14_s15, 4  }
  0xf2   :  { %13 = sbr.rel (!%p11_p4) target bundleno = 1 (0x1), region = 66 }

</bundles_post_ra>
